<compile_context>
chip_gen: v6e
topology: v6e:2x2x1
jax: 0.10.0
libtpu: 0.0.40
codegen_flags: <defaults>
</compile_context>

<pallas_src>
import functools

import jax
import jax.numpy as jnp
from jax.experimental import pallas as pl
from jax.experimental.pallas import tpu as pltpu

LANE = 128          # TPU lane width: keep last dims multiples of this
TILE_N = 128        # adj row-tile (MXU M dim)
TILE_K = 128        # adj column / reduction tile
NEG = -1e30         # "minus infinity" for padded class lanes (log_softmax mask)


def _round_up(x, m):
    return ((x + m - 1) // m) * m


def _pad2d(a, rows, cols, value=0.0):
    return jnp.pad(a, ((0, rows - a.shape[0]), (0, cols - a.shape[1])),
                   constant_values=value)


# ---------------------------------------------------------------------------
# Pallas kernels
# ---------------------------------------------------------------------------
def _xw_kernel(x_ref, w_ref, o_ref):
    # support row-tile = X_tile @ W, computed ONCE per row tile; the adj kernels
    # below consume the result instead of recomputing X@W every grid step.
    o_ref[...] = jnp.dot(x_ref[...], w_ref[...],
                         preferred_element_type=jnp.float32)


def _adj_bias_relu_kernel(adj_ref, s_ref, b_ref, o_ref, acc_ref):
    k = pl.program_id(1)

    @pl.when(k == 0)
    def _():
        acc_ref[...] = jnp.zeros_like(acc_ref)

    acc_ref[...] += jnp.dot(adj_ref[...], s_ref[...],
                            preferred_element_type=jnp.float32)

    @pl.when(k == pl.num_programs(1) - 1)
    def _():
        # BatchNorm (eval) is pre-folded into W/b, epilogue is bias + ReLU only.
        o_ref[...] = jnp.maximum(acc_ref[...] + b_ref[...], 0.0)


def _adj_bias_logsoftmax_kernel(adj_ref, s_ref, b_ref, o_ref, acc_ref):
    k = pl.program_id(1)

    @pl.when(k == 0)
    def _():
        acc_ref[...] = jnp.zeros_like(acc_ref)

    acc_ref[...] += jnp.dot(adj_ref[...], s_ref[...],
                            preferred_element_type=jnp.float32)

    @pl.when(k == pl.num_programs(1) - 1)
    def _():
        h = acc_ref[...] + b_ref[...]      # padded class lanes carry NEG bias
        m = jnp.max(h, axis=-1, keepdims=True)
        z = h - m
        lse = jnp.log(jnp.sum(jnp.exp(z), axis=-1, keepdims=True))
        o_ref[...] = z - lse


# ---------------------------------------------------------------------------
# pallas_call wrappers
# ---------------------------------------------------------------------------
def xw_matmul(x, w, *, tile_n=TILE_N):
    n, din = x.shape
    dout = w.shape[1]
    grid = (n // tile_n,)
    cost = pl.CostEstimate(
        flops=2 * n * din * dout,
        transcendentals=0,
        bytes_accessed=4 * (n * din + din * dout * grid[0] + n * dout))
    return pl.pallas_call(
        _xw_kernel,
        out_shape=jax.ShapeDtypeStruct((n, dout), jnp.float32),
        grid=grid,
        in_specs=[
            pl.BlockSpec((tile_n, din), lambda i: (i, 0)),   # x row-tile
            pl.BlockSpec((din, dout), lambda i: (0, 0)),     # W (small, resident)
        ],
        out_specs=pl.BlockSpec((tile_n, dout), lambda i: (i, 0)),
        compiler_params=pltpu.CompilerParams(dimension_semantics=("parallel",)),
        cost_estimate=cost,
    )(x, w)


def _adj_call(kernel, adj, support, bias, *, tile_n=TILE_N, tile_k=TILE_K,
              transcendentals=0):
    n = adj.shape[0]
    dout = support.shape[1]
    grid = (n // tile_n, n // tile_k)       # rows (parallel), K reduction (arbitrary, last)
    cost = pl.CostEstimate(
        flops=2 * n * n * dout,
        transcendentals=int(transcendentals),
        bytes_accessed=4 * (n * n + n * dout * grid[0] + n * dout))
    return pl.pallas_call(
        kernel,
        out_shape=jax.ShapeDtypeStruct((n, dout), jnp.float32),
        grid=grid,
        in_specs=[
            pl.BlockSpec((tile_n, tile_k), lambda i, k: (i, k)),   # adj tile
            pl.BlockSpec((tile_k, dout), lambda i, k: (k, 0)),     # support K-slice
            pl.BlockSpec((1, dout), lambda i, k: (0, 0)),          # folded bias
        ],
        out_specs=pl.BlockSpec((tile_n, dout), lambda i, k: (i, 0)),
        scratch_shapes=[pltpu.VMEM((tile_n, dout), jnp.float32)],
        compiler_params=pltpu.CompilerParams(
            dimension_semantics=("parallel", "arbitrary")),
        cost_estimate=cost,
    )(adj, support, bias)


def gcn_bias_relu(adj, support, bias):
    return _adj_call(_adj_bias_relu_kernel, adj, support, bias)


def gcn_bias_logsoftmax(adj, support, bias):
    n, dout = support.shape
    return _adj_call(_adj_bias_logsoftmax_kernel, adj, support, bias,
                     transcendentals=n * dout)


# ---------------------------------------------------------------------------
# Bjorck orthonormalization (tiny weight matrices; plain-JAX glue)
# ---------------------------------------------------------------------------
def bjorck_orthonormalize(w, iters, beta=0.5):
    def body(_, w):
        return (1.0 + beta) * w - beta * (w @ (w.T @ w))
    return jax.lax.fori_loop(0, iters, body, w)


# ---------------------------------------------------------------------------
# Full GCORN forward
# ---------------------------------------------------------------------------
@functools.partial(jax.jit, static_argnames=("bjorck_iter",))
def gcorn_forward(x, adj, conv_params, bn_params, bjorck_iter):
    n = x.shape[0]
    nclass = conv_params[-1][0].shape[1]

    # pad nodes to a tile multiple and features to lane multiples
    n_pad = _round_up(n, max(TILE_N, TILE_K))
    adj_p = _pad2d(adj, n_pad, n_pad)
    h = _pad2d(x, n_pad, _round_up(x.shape[1], LANE))

    num_layers = len(conv_params)
    out = None
    for li, (w, b) in enumerate(conv_params):
        w_o = bjorck_orthonormalize(w, bjorck_iter)
        is_last = li == num_layers - 1
        if not is_last:
            # fold eval-mode BatchNorm1d into W and b
            gamma, beta_bn, mean, var = bn_params[li]
            scale = gamma * jax.lax.rsqrt(var + 1e-5)
            w_f = w_o * scale[None, :]
            b_f = (b - mean) * scale + beta_bn
            pad_val = 0.0           # padded hidden lanes -> relu(0) = 0
        else:
            w_f, b_f = w_o, b
            pad_val = NEG           # mask padded class lanes out of log_softmax

        din, dout = w.shape
        din_p, dout_p = _round_up(din, LANE), _round_up(dout, LANE)
        w_p = _pad2d(w_f, din_p, dout_p).astype(jnp.float32)
        b_p = jnp.pad(b_f, (0, dout_p - dout),
                      constant_values=pad_val).reshape(1, dout_p).astype(jnp.float32)

        support = xw_matmul(h, w_p)                     # [n_pad, dout_p], hoisted X@W
        if not is_last:
            h = gcn_bias_relu(adj_p, support, b_p)      # dropout = identity (eval)
        else:
            out = gcn_bias_logsoftmax(adj_p, support, b_p)

    return out[:n, :nclass]


# ---------------------------------------------------------------------------
# Deterministic parameter / input construction
# ---------------------------------------------------------------------------
def build_params(key, nfeat, nhid, nclass, num_layers):
    dims = [(nfeat, nhid)] + [(nhid, nhid)] * (num_layers - 2) + [(nhid, nclass)]
    conv_params, bn_params = [], []
    for i, (din, dout) in enumerate(dims):
        key, kw, kb = jax.random.split(key, 3)
        # small uniform init keeps sigma_max(W) small so Bjorck converges
        w = jax.random.uniform(kw, (din, dout), jnp.float32, -0.1, 0.1)
        b = jax.random.uniform(kb, (dout,), jnp.float32, -0.1, 0.1)
        conv_params.append((w, b))
        if i < len(dims) - 1:
            # BatchNorm1d reset_parameters defaults: gamma=1, beta=0, mean=0, var=1
            bn_params.append((jnp.ones((dout,), jnp.float32),
                              jnp.zeros((dout,), jnp.float32),
                              jnp.zeros((dout,), jnp.float32),
                              jnp.ones((dout,), jnp.float32)))
    return conv_params, bn_params


def build_adj(key, n):
    a = (jax.random.uniform(key, (n, n)) < 0.1).astype(jnp.float32)
    a = jnp.maximum(a, a.T)                      # symmetrize
    a = a + jnp.eye(n, dtype=jnp.float32)        # self loops
    deg = jnp.sum(a, axis=1)
    dinv = jax.lax.rsqrt(deg)
    return dinv[:, None] * a * dinv[None, :]     # D^-1/2 A D^-1/2


if __name__ == "__main__":
    N, NFEAT, NHID, NCLASS = 64, 16, 32, 8
    NUM_LAYERS, BJORCK_ITER = 3, 3

    key = jax.random.PRNGKey(0)
    kx, kadj, kparam = jax.random.split(key, 3)

    x = jax.random.normal(kx, (N, NFEAT), jnp.float32)
    adj = build_adj(kadj, N)
    conv_params, bn_params = build_params(kparam, NFEAT, NHID, NCLASS, NUM_LAYERS)

    out = gcorn_forward(x, adj, tuple(conv_params), tuple(bn_params), BJORCK_ITER)
    out = jax.block_until_ready(out)

    assert out.shape == (N, NCLASS)
    assert bool(jnp.all(jnp.isfinite(out)))
    # rows of log_softmax should exp-sum to 1 (padded class lanes are masked out)
    assert bool(jnp.allclose(jnp.sum(jnp.exp(out), axis=-1), 1.0, atol=1e-4))
    print("KERNEL_OK")
</pallas_src>

<mosaic_0001>
module attributes {stable_mosaic.version = 11 : i64} {
  func.func @_xw_kernel(%arg0: i32, %arg1: memref<128x128xf32, #tpu.memory_space<vmem>>, %arg2: memref<128x128xf32, #tpu.memory_space<vmem>>, %arg3: memref<128x128xf32, #tpu.memory_space<vmem>>) attributes {dimension_semantics = [#tpu.dimension_semantics<parallel>], iteration_bounds = array<i64: 1>, scalar_prefetch = 0 : i64, scratch_operands = 0 : i64, tpu.core_type = #tpu.core_type<tc>, window_params = [{transform_indices = @transform_0, window_bounds = array<i64: 128, 128>}, {pipeline_mode = #tpu.pipeline_mode<synchronous>, transform_indices = @transform_1, window_bounds = array<i64: 128, 128>}, {transform_indices = @transform_2, window_bounds = array<i64: 128, 128>}]} {
    %c0 = arith.constant 0 : index
    %c0_0 = arith.constant 0 : index
    %0 = vector.load %arg1[%c0, %c0_0] : memref<128x128xf32, #tpu.memory_space<vmem>>, vector<128x128xf32>
    %c0_1 = arith.constant 0 : index
    %c0_2 = arith.constant 0 : index
    %1 = vector.load %arg2[%c0_1, %c0_2] : memref<128x128xf32, #tpu.memory_space<vmem>>, vector<128x128xf32>
    %cst = arith.constant dense<0.000000e+00> : vector<128x128xf32>
    %2 = tpu.matmul %0, %1, %cst {dimension_numbers = #tpu.dot_dimension_numbers<[1], [0], [0], [1], [0, 0, 1, 1], [], []>} : vector<128x128xf32>, vector<128x128xf32>, vector<128x128xf32> -> vector<128x128xf32>
    %c0_3 = arith.constant 0 : index
    %c0_4 = arith.constant 0 : index
    %3 = vector.load %arg3[%c0_3, %c0_4] : memref<128x128xf32, #tpu.memory_space<vmem>>, vector<128x128xf32>
    tpu.vector_store %arg3[%c0_3, %c0_4], %2 {strides = array<i32>} : memref<128x128xf32, #tpu.memory_space<vmem>>, vector<128x128xf32>,
    return
  }
  func.func @transform_0(%arg0: i32) -> (i32, i32) {
    %c0_i32 = arith.constant 0 : i32
    %c0_i32_0 = arith.constant 0 : i32
    return %arg0, %c0_i32 : i32, i32
  }
  func.func @transform_1(%arg0: i32) -> (i32, i32) {
    %c0_i32 = arith.constant 0 : i32
    %c0_i32_0 = arith.constant 0 : i32
    %c0_i32_1 = arith.constant 0 : i32
    return %c0_i32, %c0_i32_0 : i32, i32
  }
  func.func @transform_2(%arg0: i32) -> (i32, i32) {
    %c0_i32 = arith.constant 0 : i32
    %c0_i32_0 = arith.constant 0 : i32
    return %arg0, %c0_i32 : i32, i32
  }
}

module attributes {stable_mosaic.version = 11 : i64} {
  func.func @_adj_bias_relu_kernel(%arg0: i32, %arg1: i32, %arg2: memref<128x128xf32, #tpu.memory_space<vmem>>, %arg3: memref<128x128xf32, #tpu.memory_space<vmem>>, %arg4: memref<1x128xf32, #tpu.memory_space<vmem>>, %arg5: memref<128x128xf32, #tpu.memory_space<vmem>>, %arg6: memref<128x128xf32, #tpu.memory_space<vmem>>) attributes {dimension_semantics = [#tpu.dimension_semantics<parallel>, #tpu.dimension_semantics<arbitrary>], iteration_bounds = array<i64: 1, 1>, scalar_prefetch = 0 : i64, scratch_operands = 1 : i64, tpu.core_type = #tpu.core_type<tc>, window_params = [{transform_indices = @transform_0, window_bounds = array<i64: 128, 128>}, {transform_indices = @transform_1, window_bounds = array<i64: 128, 128>}, {pipeline_mode = #tpu.pipeline_mode<synchronous>, transform_indices = @transform_2, window_bounds = array<i64: 1, 128>}, {transform_indices = @transform_3, window_bounds = array<i64: 128, 128>}]} {
    %c0_i32 = arith.constant 0 : i32
    %0 = arith.cmpi eq, %arg1, %c0_i32 : i32
    %1 = arith.extui %0 : i1 to i32
    %c0_i32_0 = arith.constant 0 : i32
    %2 = arith.cmpi ne, %1, %c0_i32_0 : i32
    scf.if %2 {
      %cst_10 = arith.constant 0.000000e+00 : f32
      %12 = vector.broadcast %cst_10 : f32 to vector<128x128xf32>
      %c0_11 = arith.constant 0 : index
      %c0_12 = arith.constant 0 : index
      %13 = vector.load %arg6[%c0_11, %c0_12] : memref<128x128xf32, #tpu.memory_space<vmem>>, vector<128x128xf32>
      tpu.vector_store %arg6[%c0_11, %c0_12], %12 {strides = array<i32>} : memref<128x128xf32, #tpu.memory_space<vmem>>, vector<128x128xf32>,
    } else {
    }
    %c0 = arith.constant 0 : index
    %c0_1 = arith.constant 0 : index
    %3 = vector.load %arg6[%c0, %c0_1] : memref<128x128xf32, #tpu.memory_space<vmem>>, vector<128x128xf32>
    %c0_2 = arith.constant 0 : index
    %c0_3 = arith.constant 0 : index
    %4 = vector.load %arg2[%c0_2, %c0_3] : memref<128x128xf32, #tpu.memory_space<vmem>>, vector<128x128xf32>
    %c0_4 = arith.constant 0 : index
    %c0_5 = arith.constant 0 : index
    %5 = vector.load %arg3[%c0_4, %c0_5] : memref<128x128xf32, #tpu.memory_space<vmem>>, vector<128x128xf32>
    %cst = arith.constant dense<0.000000e+00> : vector<128x128xf32>
    %6 = tpu.matmul %4, %5, %cst {dimension_numbers = #tpu.dot_dimension_numbers<[1], [0], [0], [1], [0, 0, 1, 1], [], []>} : vector<128x128xf32>, vector<128x128xf32>, vector<128x128xf32> -> vector<128x128xf32>
    %7 = arith.addf %3, %6 : vector<128x128xf32>
    %c0_6 = arith.constant 0 : index
    %c0_7 = arith.constant 0 : index
    %8 = vector.load %arg6[%c0_6, %c0_7] : memref<128x128xf32, #tpu.memory_space<vmem>>, vector<128x128xf32>
    tpu.vector_store %arg6[%c0_6, %c0_7], %7 {strides = array<i32>} : memref<128x128xf32, #tpu.memory_space<vmem>>, vector<128x128xf32>,
    %c0_i32_8 = arith.constant 0 : i32
    %9 = arith.cmpi eq, %arg1, %c0_i32_8 : i32
    %10 = arith.extui %9 : i1 to i32
    %c0_i32_9 = arith.constant 0 : i32
    %11 = arith.cmpi ne, %10, %c0_i32_9 : i32
    scf.if %11 {
      %c0_10 = arith.constant 0 : index
      %c0_11 = arith.constant 0 : index
      %12 = vector.load %arg6[%c0_10, %c0_11] : memref<128x128xf32, #tpu.memory_space<vmem>>, vector<128x128xf32>
      %c0_12 = arith.constant 0 : index
      %c0_13 = arith.constant 0 : index
      %13 = vector.load %arg4[%c0_12, %c0_13] : memref<1x128xf32, #tpu.memory_space<vmem>>, vector<1x128xf32>
      %14 = vector.broadcast %13 : vector<1x128xf32> to vector<128x128xf32>
      %15 = arith.addf %12, %14 : vector<128x128xf32>
      %cst_14 = arith.constant 0.000000e+00 : f32
      %16 = vector.broadcast %cst_14 : f32 to vector<128x128xf32>
      %17 = arith.maximumf %15, %16 : vector<128x128xf32>
      %c0_15 = arith.constant 0 : index
      %c0_16 = arith.constant 0 : index
      %18 = vector.load %arg5[%c0_15, %c0_16] : memref<128x128xf32, #tpu.memory_space<vmem>>, vector<128x128xf32>
      tpu.vector_store %arg5[%c0_15, %c0_16], %17 {strides = array<i32>} : memref<128x128xf32, #tpu.memory_space<vmem>>, vector<128x128xf32>,
    } else {
    }
    return
  }
  func.func @transform_0(%arg0: i32, %arg1: i32) -> (i32, i32) {
    %c0_i32 = arith.constant 0 : i32
    return %arg0, %arg1 : i32, i32
  }
  func.func @transform_1(%arg0: i32, %arg1: i32) -> (i32, i32) {
    %c0_i32 = arith.constant 0 : i32
    %c0_i32_0 = arith.constant 0 : i32
    return %arg1, %c0_i32 : i32, i32
  }
  func.func @transform_2(%arg0: i32, %arg1: i32) -> (i32, i32) {
    %c0_i32 = arith.constant 0 : i32
    %c0_i32_0 = arith.constant 0 : i32
    %c0_i32_1 = arith.constant 0 : i32
    return %c0_i32, %c0_i32_0 : i32, i32
  }
  func.func @transform_3(%arg0: i32, %arg1: i32) -> (i32, i32) {
    %c0_i32 = arith.constant 0 : i32
    %c0_i32_0 = arith.constant 0 : i32
    return %arg0, %c0_i32 : i32, i32
  }
}

module attributes {stable_mosaic.version = 11 : i64} {
  func.func @_adj_bias_logsoftmax_kernel(%arg0: i32, %arg1: i32, %arg2: memref<128x128xf32, #tpu.memory_space<vmem>>, %arg3: memref<128x128xf32, #tpu.memory_space<vmem>>, %arg4: memref<1x128xf32, #tpu.memory_space<vmem>>, %arg5: memref<128x128xf32, #tpu.memory_space<vmem>>, %arg6: memref<128x128xf32, #tpu.memory_space<vmem>>) attributes {dimension_semantics = [#tpu.dimension_semantics<parallel>, #tpu.dimension_semantics<arbitrary>], iteration_bounds = array<i64: 1, 1>, scalar_prefetch = 0 : i64, scratch_operands = 1 : i64, tpu.core_type = #tpu.core_type<tc>, window_params = [{transform_indices = @transform_0, window_bounds = array<i64: 128, 128>}, {transform_indices = @transform_1, window_bounds = array<i64: 128, 128>}, {pipeline_mode = #tpu.pipeline_mode<synchronous>, transform_indices = @transform_2, window_bounds = array<i64: 1, 128>}, {transform_indices = @transform_3, window_bounds = array<i64: 128, 128>}]} {
    %c0_i32 = arith.constant 0 : i32
    %0 = arith.cmpi eq, %arg1, %c0_i32 : i32
    %1 = arith.extui %0 : i1 to i32
    %c0_i32_0 = arith.constant 0 : i32
    %2 = arith.cmpi ne, %1, %c0_i32_0 : i32
    scf.if %2 {
      %cst_10 = arith.constant 0.000000e+00 : f32
      %12 = vector.broadcast %cst_10 : f32 to vector<128x128xf32>
      %c0_11 = arith.constant 0 : index
      %c0_12 = arith.constant 0 : index
      %13 = vector.load %arg6[%c0_11, %c0_12] : memref<128x128xf32, #tpu.memory_space<vmem>>, vector<128x128xf32>
      tpu.vector_store %arg6[%c0_11, %c0_12], %12 {strides = array<i32>} : memref<128x128xf32, #tpu.memory_space<vmem>>, vector<128x128xf32>,
    } else {
    }
    %c0 = arith.constant 0 : index
    %c0_1 = arith.constant 0 : index
    %3 = vector.load %arg6[%c0, %c0_1] : memref<128x128xf32, #tpu.memory_space<vmem>>, vector<128x128xf32>
    %c0_2 = arith.constant 0 : index
    %c0_3 = arith.constant 0 : index
    %4 = vector.load %arg2[%c0_2, %c0_3] : memref<128x128xf32, #tpu.memory_space<vmem>>, vector<128x128xf32>
    %c0_4 = arith.constant 0 : index
    %c0_5 = arith.constant 0 : index
    %5 = vector.load %arg3[%c0_4, %c0_5] : memref<128x128xf32, #tpu.memory_space<vmem>>, vector<128x128xf32>
    %cst = arith.constant dense<0.000000e+00> : vector<128x128xf32>
    %6 = tpu.matmul %4, %5, %cst {dimension_numbers = #tpu.dot_dimension_numbers<[1], [0], [0], [1], [0, 0, 1, 1], [], []>} : vector<128x128xf32>, vector<128x128xf32>, vector<128x128xf32> -> vector<128x128xf32>
    %7 = arith.addf %3, %6 : vector<128x128xf32>
    %c0_6 = arith.constant 0 : index
    %c0_7 = arith.constant 0 : index
    %8 = vector.load %arg6[%c0_6, %c0_7] : memref<128x128xf32, #tpu.memory_space<vmem>>, vector<128x128xf32>
    tpu.vector_store %arg6[%c0_6, %c0_7], %7 {strides = array<i32>} : memref<128x128xf32, #tpu.memory_space<vmem>>, vector<128x128xf32>,
    %c0_i32_8 = arith.constant 0 : i32
    %9 = arith.cmpi eq, %arg1, %c0_i32_8 : i32
    %10 = arith.extui %9 : i1 to i32
    %c0_i32_9 = arith.constant 0 : i32
    %11 = arith.cmpi ne, %10, %c0_i32_9 : i32
    scf.if %11 {
      %c0_10 = arith.constant 0 : index
      %c0_11 = arith.constant 0 : index
      %12 = vector.load %arg6[%c0_10, %c0_11] : memref<128x128xf32, #tpu.memory_space<vmem>>, vector<128x128xf32>
      %c0_12 = arith.constant 0 : index
      %c0_13 = arith.constant 0 : index
      %13 = vector.load %arg4[%c0_12, %c0_13] : memref<1x128xf32, #tpu.memory_space<vmem>>, vector<1x128xf32>
      %14 = vector.broadcast %13 : vector<1x128xf32> to vector<128x128xf32>
      %15 = arith.addf %12, %14 : vector<128x128xf32>
      %cst_14 = arith.constant dense<0xFF800000> : vector<128xf32>
      %16 = vector.multi_reduction <maximumf>, %15, %cst_14 [1] : vector<128x128xf32> to vector<128xf32>
      %17 = vector.shape_cast %16 : vector<128xf32> to vector<128x1xf32>
      %18 = vector.broadcast %17 : vector<128x1xf32> to vector<128x128xf32>
      %19 = arith.subf %15, %18 : vector<128x128xf32>
      %20 = math.exp %19 : vector<128x128xf32>
      %cst_15 = arith.constant dense<0.000000e+00> : vector<128xf32>
      %21 = vector.multi_reduction <add>, %20, %cst_15 [1] : vector<128x128xf32> to vector<128xf32>
      %22 = vector.shape_cast %21 : vector<128xf32> to vector<128x1xf32>
      %23 = math.log %22 : vector<128x1xf32>
      %24 = vector.broadcast %23 : vector<128x1xf32> to vector<128x128xf32>
      %25 = arith.subf %19, %24 : vector<128x128xf32>
      %c0_16 = arith.constant 0 : index
      %c0_17 = arith.constant 0 : index
      %26 = vector.load %arg5[%c0_16, %c0_17] : memref<128x128xf32, #tpu.memory_space<vmem>>, vector<128x128xf32>
      tpu.vector_store %arg5[%c0_16, %c0_17], %25 {strides = array<i32>} : memref<128x128xf32, #tpu.memory_space<vmem>>, vector<128x128xf32>,
    } else {
    }
    return
  }
  func.func @transform_0(%arg0: i32, %arg1: i32) -> (i32, i32) {
    %c0_i32 = arith.constant 0 : i32
    return %arg0, %arg1 : i32, i32
  }
  func.func @transform_1(%arg0: i32, %arg1: i32) -> (i32, i32) {
    %c0_i32 = arith.constant 0 : i32
    %c0_i32_0 = arith.constant 0 : i32
    return %arg1, %c0_i32 : i32, i32
  }
  func.func @transform_2(%arg0: i32, %arg1: i32) -> (i32, i32) {
    %c0_i32 = arith.constant 0 : i32
    %c0_i32_0 = arith.constant 0 : i32
    %c0_i32_1 = arith.constant 0 : i32
    return %c0_i32, %c0_i32_0 : i32, i32
  }
  func.func @transform_3(%arg0: i32, %arg1: i32) -> (i32, i32) {
    %c0_i32 = arith.constant 0 : i32
    %c0_i32_0 = arith.constant 0 : i32
    return %arg0, %c0_i32 : i32, i32
  }
}

</mosaic_0001>

<bundles_post_ra>
// kernel: gcorn_forward.6
= control target key start
LH: loop header
LB: loop body
LE: loop exit
PB: predicated region body
PF: predicated region fallthrough
CT: control target
= control target key end

     0   :  { %s487_s1 = inlined_call_operand.vmem [shape: f32[128,128], index: 1, kind: input, shape index: {}]   ;;  %s488_s0 = inlined_call_operand.vmem [shape: f32[128,128], index: 0, kind: input, shape index: {}]   ;;  %s489_s2 = inlined_call_operand.vmem [shape: f32[128,128], index: 2, kind: output, shape index: {}]  }
   0x1   :  { %v42_v0 = vld [vmem:[%s487_s1 + $0x78] sm:$0xff]  ;;  %v41_v1 = vld [vmem:[%s487_s1 + $0x70] sm:$0xff]  ;;  %v40_v2 = vld [vmem:[%s487_s1 + $0x68] sm:$0xff] }
   0x2   :  { %240 = vmatprep.subr.mxu0 %v42_v0  ;;  %296 = vmatprep.subr.mxu1 %v42_v0  ;;  %v39_v3 = vld [vmem:[%s487_s1 + $0x60] sm:$0xff]  ;;  %v38_v4 = vld [vmem:[%s487_s1 + $0x58] sm:$0xff]  ;;  %v37_v5 = vld [vmem:[%s487_s1 + $0x50] sm:$0xff] }
   0x3   :  { %241 = vmatpush3.msra.mxu0 %v42_v0  ;;  %312 = vmatpush3.msra.mxu1 %v42_v0  ;;  %v36_v6 = vld [vmem:[%s487_s1 + $0x48] sm:$0xff]  ;;  %v35_v7 = vld [vmem:[%s487_s1 + $0x40] sm:$0xff]  ;;  %v34_v8 = vld [vmem:[%s487_s1 + $0x38] sm:$0xff] }
   0x4   :  { %242 = vmatprep.subr.mxu0 %v41_v1  ;;  %297 = vmatprep.subr.mxu1 %v41_v1  ;;  %v33_v9 = vld [vmem:[%s487_s1 + $0x30] sm:$0xff]  ;;  %v32_v10 = vld [vmem:[%s487_s1 + $0x28] sm:$0xff]  ;;  %v31_v11 = vld [vmem:[%s487_s1 + $0x20] sm:$0xff] }
   0x5   :  { %243 = vmatpush3.msra.mxu0 %v41_v1  ;;  %313 = vmatpush3.msra.mxu1 %v41_v1  ;;  %v30_v12 = vld [vmem:[%s487_s1 + $0x18] sm:$0xff]  ;;  %v29_v13 = vld [vmem:[%s487_s1 + $0x10] sm:$0xff]  ;;  %v28_v14 = vld [vmem:[%s487_s1 + $0x8] sm:$0xff] }
   0x6   :  { %244 = vmatprep.subr.mxu0 %v40_v2  ;;  %298 = vmatprep.subr.mxu1 %v40_v2  ;;  %v27_v15 = vld [vmem:[%s487_s1] sm:$0xff]  ;;  %v12_v18 = vld [vmem:[%s488_s0 + $0x8] sm:$0xff]  ;;  %v13_v20 = vld [vmem:[%s488_s0 + $0x10] sm:$0xff] }
   0x7   :  { %245 = vmatpush3.msra.mxu0 %v40_v2  ;;  %314 = vmatpush3.msra.mxu1 %v40_v2  ;;  %v11_v16 = vld [vmem:[%s488_s0] sm:$0xff]  ;;  %v20_v19 = vld [vmem:[%s488_s0 + $0x48] sm:$0xff]  ;;  %v21_v21 = vld [vmem:[%s488_s0 + $0x50] sm:$0xff] }
   0x8   :  { %246 = vmatprep.subr.mxu0 %v39_v3  ;;  %299 = vmatprep.subr.mxu1 %v39_v3  ;;  %v19_v17 = vld [vmem:[%s488_s0 + $0x40] sm:$0xff]  ;;  %v14_v22 = vld [vmem:[%s488_s0 + $0x18] sm:$0xff]  ;;  %v16_v26 = vld [vmem:[%s488_s0 + $0x28] sm:$0xff] }
   0x9   :  { %247 = vmatpush3.msra.mxu0 %v39_v3  ;;  %315 = vmatpush3.msra.mxu1 %v39_v3  ;;  %v22_v23 = vld [vmem:[%s488_s0 + $0x58] sm:$0xff]  ;;  %v15_v24 = vld [vmem:[%s488_s0 + $0x20] sm:$0xff]  ;;  %v24_v27 = vld [vmem:[%s488_s0 + $0x68] sm:$0xff] }
   0xa   :  { %248 = vmatprep.subr.mxu0 %v38_v4  ;;  %300 = vmatprep.subr.mxu1 %v38_v4  ;;  %v23_v25 = vld [vmem:[%s488_s0 + $0x60] sm:$0xff]  ;;  %v17_v28 = vld [vmem:[%s488_s0 + $0x30] sm:$0xff]  ;;  %v18_v30 = vld [vmem:[%s488_s0 + $0x38] sm:$0xff] }
   0xb   :  { %249 = vmatpush3.msra.mxu0 %v38_v4  ;;  %316 = vmatpush3.msra.mxu1 %v38_v4  ;;  %v25_v29 = vld [vmem:[%s488_s0 + $0x70] sm:$0xff]  ;;  %v26_v31 = vld [vmem:[%s488_s0 + $0x78] sm:$0xff] }
   0xc   :  { %250 = vmatprep.subr.mxu0 %v37_v5  ;;  %301 = vmatprep.subr.mxu1 %v37_v5 }
   0xd   :  { %251 = vmatpush3.msra.mxu0 %v37_v5  ;;  %317 = vmatpush3.msra.mxu1 %v37_v5 }
   0xe   :  { %252 = vmatprep.subr.mxu0 %v36_v6  ;;  %302 = vmatprep.subr.mxu1 %v36_v6 }
   0xf   :  { %253 = vmatpush3.msra.mxu0 %v36_v6  ;;  %318 = vmatpush3.msra.mxu1 %v36_v6 }
  0x10   :  { %254 = vmatprep.subr.mxu0 %v35_v7  ;;  %303 = vmatprep.subr.mxu1 %v35_v7 }
  0x11   :  { %255 = vmatpush3.msra.mxu0 %v35_v7  ;;  %319 = vmatpush3.msra.mxu1 %v35_v7 }
  0x12   :  { %256 = vmatprep.subr.mxu0 %v34_v8  ;;  %304 = vmatprep.subr.mxu1 %v34_v8 }
  0x13   :  { %257 = vmatpush3.msra.mxu0 %v34_v8  ;;  %320 = vmatpush3.msra.mxu1 %v34_v8 }
  0x14   :  { %258 = vmatprep.subr.mxu0 %v33_v9  ;;  %305 = vmatprep.subr.mxu1 %v33_v9 }
  0x15   :  { %259 = vmatpush3.msra.mxu0 %v33_v9  ;;  %321 = vmatpush3.msra.mxu1 %v33_v9 }
  0x16   :  { %260 = vmatprep.subr.mxu0 %v32_v10  ;;  %306 = vmatprep.subr.mxu1 %v32_v10 }
  0x17   :  { %261 = vmatpush3.msra.mxu0 %v32_v10  ;;  %322 = vmatpush3.msra.mxu1 %v32_v10 }
  0x18   :  { %262 = vmatprep.subr.mxu0 %v31_v11  ;;  %307 = vmatprep.subr.mxu1 %v31_v11 }
  0x19   :  { %263 = vmatpush3.msra.mxu0 %v31_v11  ;;  %323 = vmatpush3.msra.mxu1 %v31_v11 }
  0x1a   :  { %264 = vmatprep.subr.mxu0 %v30_v12  ;;  %308 = vmatprep.subr.mxu1 %v30_v12 }
  0x1b   :  { %265 = vmatpush3.msra.mxu0 %v30_v12  ;;  %324 = vmatpush3.msra.mxu1 %v30_v12 }
  0x1c   :  { %266 = vmatprep.subr.mxu0 %v29_v13  ;;  %309 = vmatprep.subr.mxu1 %v29_v13 }
  0x1d   :  { %267 = vmatpush3.msra.mxu0 %v29_v13  ;;  %325 = vmatpush3.msra.mxu1 %v29_v13 }
  0x1e   :  { %268 = vmatprep.subr.mxu0 %v28_v14  ;;  %310 = vmatprep.subr.mxu1 %v28_v14 }
  0x1f   :  { %269 = vmatpush3.msra.mxu0 %v28_v14  ;;  %326 = vmatpush3.msra.mxu1 %v28_v14 }
  0x20   :  { %270 = vmatprep.subr.mxu0 %v27_v15  ;;  %311 = vmatprep.subr.mxu1 %v27_v15 }
  0x21   :  { %271 = vmatpush3.msra.mxu0 %v27_v15  ;;  %327 = vmatpush3.msra.mxu1 %v27_v15 }
  0x22   :  { %272 = vmatprep.mubr.f32.mxu0 %v11_v16  ;;  %284 = vmatprep.mubr.f32.mxu1 %v19_v17 }
  0x23   :  { %273 = vmatmul.mubr.f32.vlgmr.msra.gmra.mxu0 %v12_v18  ;;  %285 = vmatmul.mubr.f32.vlgmr.msra.gmra.mxu1 %v20_v19 }
  0x24   :  { %275 = vmatprep.mubr.f32.mxu0 %v13_v20  ;;  %287 = vmatprep.mubr.f32.mxu1 %v21_v21 }
  0x27   :  { %276 = vmatmul.mubr.f32.gmra.mxu0 %v14_v22  ;;  %288 = vmatmul.mubr.f32.gmra.mxu1 %v22_v23 }
  0x28   :  { %278 = vmatprep.mubr.f32.mxu0 %v15_v24  ;;  %290 = vmatprep.mubr.f32.mxu1 %v23_v25 }
  0x2b   :  { %279 = vmatmul.mubr.f32.gmra.mxu0 %v16_v26  ;;  %291 = vmatmul.mubr.f32.gmra.mxu1 %v24_v27 }
  0x2c   :  { %281 = vmatprep.mubr.f32.mxu0 %v17_v28  ;;  %293 = vmatprep.mubr.f32.mxu1 %v25_v29 }
  0x2f   :  { %282 = vmatmul.mubr.f32.gmra.mxu0 %v18_v30  ;;  %294 = vmatmul.mubr.f32.gmra.mxu1 %v26_v31 }
  0xe3   :  { %v274_v32 = vpop.f32.mrf.mxu0  ;;  %v286_v33 = vpop.f32.mrf.mxu1 }
  0xe4   :  { %189 = vst [vmem:[%s489_s2 + $0x8] sm:$0xff] %v274_v32  ;;  %197 = vst [vmem:[%s489_s2 + $0x48] sm:$0xff] %v286_v33 }
  0xe5   :  { %v109_v34 = vpop.f32.mrf.mxu0  ;;  %v149_v35 = vpop.f32.mrf.mxu1 }
  0xe6   :  { %188 = vst [vmem:[%s489_s2] sm:$0xff] %v109_v34  ;;  %196 = vst [vmem:[%s489_s2 + $0x40] sm:$0xff] %v149_v35 }
  0xe7   :  { %v277_v36 = vpop.f32.mrf.mxu0  ;;  %v289_v37 = vpop.f32.mrf.mxu1 }
  0xe8   :  { %191 = vst [vmem:[%s489_s2 + $0x18] sm:$0xff] %v277_v36  ;;  %199 = vst [vmem:[%s489_s2 + $0x58] sm:$0xff] %v289_v37 }
  0xe9   :  { %v119_v38 = vpop.f32.mrf.mxu0  ;;  %v159_v39 = vpop.f32.mrf.mxu1 }
  0xea   :  { %190 = vst [vmem:[%s489_s2 + $0x10] sm:$0xff] %v119_v38  ;;  %198 = vst [vmem:[%s489_s2 + $0x50] sm:$0xff] %v159_v39 }
  0xeb   :  { %v280_v40 = vpop.f32.mrf.mxu0  ;;  %v292_v41 = vpop.f32.mrf.mxu1 }
  0xec   :  { %193 = vst [vmem:[%s489_s2 + $0x28] sm:$0xff] %v280_v40  ;;  %201 = vst [vmem:[%s489_s2 + $0x68] sm:$0xff] %v292_v41 }
  0xed   :  { %v129_v42 = vpop.f32.mrf.mxu0  ;;  %v169_v43 = vpop.f32.mrf.mxu1 }
  0xee   :  { %192 = vst [vmem:[%s489_s2 + $0x20] sm:$0xff] %v129_v42  ;;  %200 = vst [vmem:[%s489_s2 + $0x60] sm:$0xff] %v169_v43 }
  0xef   :  { %v283_v44 = vpop.f32.mrf.mxu0  ;;  %v295_v45 = vpop.f32.mrf.mxu1 }
  0xf0   :  { %195 = vst [vmem:[%s489_s2 + $0x38] sm:$0xff] %v283_v44  ;;  %203 = vst [vmem:[%s489_s2 + $0x78] sm:$0xff] %v295_v45 }
  0xf1   :  { %v139_v46 = vpop.f32.mrf.mxu0  ;;  %v179_v47 = vpop.f32.mrf.mxu1 }
  0xf2   :  { %194 = vst [vmem:[%s489_s2 + $0x30] sm:$0xff] %v139_v46  ;;  %202 = vst [vmem:[%s489_s2 + $0x70] sm:$0xff] %v179_v47 }

// kernel: gcorn_forward.7
= control target key start
LH: loop header
LB: loop body
LE: loop exit
PB: predicated region body
PF: predicated region fallthrough
CT: control target
= control target key end

     0   :  { %s625_s1 = inlined_call_operand.vmem [shape: f32[128,128], index: 1, kind: input, shape index: {}]   ;;  %s626_s0 = inlined_call_operand.vmem [shape: f32[128,128], index: 0, kind: input, shape index: {}]   ;;  %s627_s2 = inlined_call_operand.vmem [shape: f32[1,128], index: 2, kind: input, shape index: {}]   ;;  %s628_s3 = inlined_call_operand.vmem [shape: f32[128,128], index: 3, kind: output, shape index: {}]  }
   0x1   :  { %v81_v0 = vld [vmem:[%s625_s1 + $0x78] sm:$0xff]  ;;  %v80_v1 = vld [vmem:[%s625_s1 + $0x70] sm:$0xff]  ;;  %v79_v2 = vld [vmem:[%s625_s1 + $0x68] sm:$0xff] }
   0x2   :  { %370 = vmatprep.subr.mxu0 %v81_v0  ;;  %426 = vmatprep.subr.mxu1 %v81_v0  ;;  %v78_v3 = vld [vmem:[%s625_s1 + $0x60] sm:$0xff]  ;;  %v77_v4 = vld [vmem:[%s625_s1 + $0x58] sm:$0xff]  ;;  %v76_v5 = vld [vmem:[%s625_s1 + $0x50] sm:$0xff] }
   0x3   :  { %371 = vmatpush3.msra.mxu0 %v81_v0  ;;  %442 = vmatpush3.msra.mxu1 %v81_v0  ;;  %v75_v6 = vld [vmem:[%s625_s1 + $0x48] sm:$0xff]  ;;  %v74_v7 = vld [vmem:[%s625_s1 + $0x40] sm:$0xff]  ;;  %v73_v8 = vld [vmem:[%s625_s1 + $0x38] sm:$0xff] }
   0x4   :  { %372 = vmatprep.subr.mxu0 %v80_v1  ;;  %427 = vmatprep.subr.mxu1 %v80_v1  ;;  %v72_v9 = vld [vmem:[%s625_s1 + $0x30] sm:$0xff]  ;;  %v71_v10 = vld [vmem:[%s625_s1 + $0x28] sm:$0xff]  ;;  %v70_v11 = vld [vmem:[%s625_s1 + $0x20] sm:$0xff] }
   0x5   :  { %373 = vmatpush3.msra.mxu0 %v80_v1  ;;  %443 = vmatpush3.msra.mxu1 %v80_v1  ;;  %v69_v12 = vld [vmem:[%s625_s1 + $0x18] sm:$0xff]  ;;  %v68_v13 = vld [vmem:[%s625_s1 + $0x10] sm:$0xff]  ;;  %v67_v14 = vld [vmem:[%s625_s1 + $0x8] sm:$0xff] }
   0x6   :  { %374 = vmatprep.subr.mxu0 %v79_v2  ;;  %428 = vmatprep.subr.mxu1 %v79_v2  ;;  %v66_v15 = vld [vmem:[%s625_s1] sm:$0xff]  ;;  %v51_v18 = vld [vmem:[%s626_s0 + $0x8] sm:$0xff]  ;;  %v52_v20 = vld [vmem:[%s626_s0 + $0x10] sm:$0xff] }
   0x7   :  { %375 = vmatpush3.msra.mxu0 %v79_v2  ;;  %444 = vmatpush3.msra.mxu1 %v79_v2  ;;  %v50_v16 = vld [vmem:[%s626_s0] sm:$0xff]  ;;  %v59_v19 = vld [vmem:[%s626_s0 + $0x48] sm:$0xff]  ;;  %v60_v21 = vld [vmem:[%s626_s0 + $0x50] sm:$0xff] }
   0x8   :  { %376 = vmatprep.subr.mxu0 %v78_v3  ;;  %429 = vmatprep.subr.mxu1 %v78_v3  ;;  %v58_v17 = vld [vmem:[%s626_s0 + $0x40] sm:$0xff]  ;;  %v53_v22 = vld [vmem:[%s626_s0 + $0x18] sm:$0xff]  ;;  %v55_v26 = vld [vmem:[%s626_s0 + $0x28] sm:$0xff] }
   0x9   :  { %377 = vmatpush3.msra.mxu0 %v78_v3  ;;  %445 = vmatpush3.msra.mxu1 %v78_v3  ;;  %v61_v23 = vld [vmem:[%s626_s0 + $0x58] sm:$0xff]  ;;  %v54_v24 = vld [vmem:[%s626_s0 + $0x20] sm:$0xff]  ;;  %v63_v27 = vld [vmem:[%s626_s0 + $0x68] sm:$0xff] }
   0xa   :  { %378 = vmatprep.subr.mxu0 %v77_v4  ;;  %430 = vmatprep.subr.mxu1 %v77_v4  ;;  %v62_v25 = vld [vmem:[%s626_s0 + $0x60] sm:$0xff]  ;;  %v56_v28 = vld [vmem:[%s626_s0 + $0x30] sm:$0xff]  ;;  %v57_v30 = vld [vmem:[%s626_s0 + $0x38] sm:$0xff] }
   0xb   :  { %379 = vmatpush3.msra.mxu0 %v77_v4  ;;  %446 = vmatpush3.msra.mxu1 %v77_v4  ;;  %v64_v29 = vld [vmem:[%s626_s0 + $0x70] sm:$0xff]  ;;  %v65_v31 = vld [vmem:[%s626_s0 + $0x78] sm:$0xff]  ;;  %v337_v32 = vld [vmem:[%s627_s2] ss:$0 sm:$0xff] }
   0xc   :  { %380 = vmatprep.subr.mxu0 %v76_v5  ;;  %431 = vmatprep.subr.mxu1 %v76_v5 }
   0xd   :  { %381 = vmatpush3.msra.mxu0 %v76_v5  ;;  %447 = vmatpush3.msra.mxu1 %v76_v5 }
   0xe   :  { %382 = vmatprep.subr.mxu0 %v75_v6  ;;  %432 = vmatprep.subr.mxu1 %v75_v6 }
   0xf   :  { %383 = vmatpush3.msra.mxu0 %v75_v6  ;;  %448 = vmatpush3.msra.mxu1 %v75_v6 }
  0x10   :  { %384 = vmatprep.subr.mxu0 %v74_v7  ;;  %433 = vmatprep.subr.mxu1 %v74_v7 }
  0x11   :  { %385 = vmatpush3.msra.mxu0 %v74_v7  ;;  %449 = vmatpush3.msra.mxu1 %v74_v7 }
  0x12   :  { %386 = vmatprep.subr.mxu0 %v73_v8  ;;  %434 = vmatprep.subr.mxu1 %v73_v8 }
  0x13   :  { %387 = vmatpush3.msra.mxu0 %v73_v8  ;;  %450 = vmatpush3.msra.mxu1 %v73_v8 }
  0x14   :  { %388 = vmatprep.subr.mxu0 %v72_v9  ;;  %435 = vmatprep.subr.mxu1 %v72_v9 }
  0x15   :  { %389 = vmatpush3.msra.mxu0 %v72_v9  ;;  %451 = vmatpush3.msra.mxu1 %v72_v9 }
  0x16   :  { %390 = vmatprep.subr.mxu0 %v71_v10  ;;  %436 = vmatprep.subr.mxu1 %v71_v10 }
  0x17   :  { %391 = vmatpush3.msra.mxu0 %v71_v10  ;;  %452 = vmatpush3.msra.mxu1 %v71_v10 }
  0x18   :  { %392 = vmatprep.subr.mxu0 %v70_v11  ;;  %437 = vmatprep.subr.mxu1 %v70_v11 }
  0x19   :  { %393 = vmatpush3.msra.mxu0 %v70_v11  ;;  %453 = vmatpush3.msra.mxu1 %v70_v11 }
  0x1a   :  { %394 = vmatprep.subr.mxu0 %v69_v12  ;;  %438 = vmatprep.subr.mxu1 %v69_v12 }
  0x1b   :  { %395 = vmatpush3.msra.mxu0 %v69_v12  ;;  %454 = vmatpush3.msra.mxu1 %v69_v12 }
  0x1c   :  { %396 = vmatprep.subr.mxu0 %v68_v13  ;;  %439 = vmatprep.subr.mxu1 %v68_v13 }
  0x1d   :  { %397 = vmatpush3.msra.mxu0 %v68_v13  ;;  %455 = vmatpush3.msra.mxu1 %v68_v13 }
  0x1e   :  { %398 = vmatprep.subr.mxu0 %v67_v14  ;;  %440 = vmatprep.subr.mxu1 %v67_v14 }
  0x1f   :  { %399 = vmatpush3.msra.mxu0 %v67_v14  ;;  %456 = vmatpush3.msra.mxu1 %v67_v14 }
  0x20   :  { %400 = vmatprep.subr.mxu0 %v66_v15  ;;  %441 = vmatprep.subr.mxu1 %v66_v15 }
  0x21   :  { %401 = vmatpush3.msra.mxu0 %v66_v15  ;;  %457 = vmatpush3.msra.mxu1 %v66_v15 }
  0x22   :  { %402 = vmatprep.mubr.f32.mxu0 %v50_v16  ;;  %414 = vmatprep.mubr.f32.mxu1 %v58_v17 }
  0x23   :  { %403 = vmatmul.mubr.f32.vlgmr.msra.gmra.mxu0 %v51_v18  ;;  %415 = vmatmul.mubr.f32.vlgmr.msra.gmra.mxu1 %v59_v19 }
  0x24   :  { %405 = vmatprep.mubr.f32.mxu0 %v52_v20  ;;  %417 = vmatprep.mubr.f32.mxu1 %v60_v21 }
  0x27   :  { %406 = vmatmul.mubr.f32.gmra.mxu0 %v53_v22  ;;  %418 = vmatmul.mubr.f32.gmra.mxu1 %v61_v23 }
  0x28   :  { %408 = vmatprep.mubr.f32.mxu0 %v54_v24  ;;  %420 = vmatprep.mubr.f32.mxu1 %v62_v25 }
  0x2b   :  { %409 = vmatmul.mubr.f32.gmra.mxu0 %v55_v26  ;;  %421 = vmatmul.mubr.f32.gmra.mxu1 %v63_v27 }
  0x2c   :  { %411 = vmatprep.mubr.f32.mxu0 %v56_v28  ;;  %423 = vmatprep.mubr.f32.mxu1 %v64_v29 }
  0x2f   :  { %412 = vmatmul.mubr.f32.gmra.mxu0 %v57_v30  ;;  %424 = vmatmul.mubr.f32.gmra.mxu1 %v65_v31 }
  0xe3   :  { %v404_v33 = vpop.f32.mrf.mxu0  ;;  %v416_v34 = vpop.f32.mrf.mxu1 }
  0xe4   :  { %v286_v35 = vadd.f32 %v404_v33, %v337_v32  ;;  %v294_v36 = vadd.f32 %v416_v34, %v337_v32 }
  0xe5   :  { %v148_v37 = vpop.f32.mrf.mxu0  ;;  %v188_v38 = vpop.f32.mrf.mxu1 }
  0xe6   :  { %v302_v39 = vmax.f32 %v286_v35, 0.0  ;;  %v310_v40 = vmax.f32 %v294_v36, 0.0  ;;  %v285_v41 = vadd.f32 %v337_v32, %v148_v37  ;;  %v293_v42 = vadd.f32 %v337_v32, %v188_v38 }
  0xe7   :  { %v407_v43 = vpop.f32.mrf.mxu0  ;;  %v419_v44 = vpop.f32.mrf.mxu1 }
  0xe8   :  { %318 = vst [vmem:[%s628_s3 + $0x8] sm:$0xff] %v302_v39  ;;  %326 = vst [vmem:[%s628_s3 + $0x48] sm:$0xff] %v310_v40  ;;  %v301_v45 = vmax.f32 %v285_v41, 0.0  ;;  %v309_v46 = vmax.f32 %v293_v42, 0.0  ;;  %v288_v47 = vadd.f32 %v407_v43, %v337_v32  ;;  %v296_v48 = vadd.f32 %v419_v44, %v337_v32 }
  0xe9   :  { %v158_v49 = vpop.f32.mrf.mxu0  ;;  %v198_v50 = vpop.f32.mrf.mxu1 }
  0xea   :  { %317 = vst [vmem:[%s628_s3] sm:$0xff] %v301_v45  ;;  %325 = vst [vmem:[%s628_s3 + $0x40] sm:$0xff] %v309_v46  ;;  %v304_v51 = vmax.f32 %v288_v47, 0.0  ;;  %v312_v52 = vmax.f32 %v296_v48, 0.0  ;;  %v287_v53 = vadd.f32 %v337_v32, %v158_v49  ;;  %v295_v54 = vadd.f32 %v337_v32, %v198_v50 }
  0xeb   :  { %v410_v55 = vpop.f32.mrf.mxu0  ;;  %v422_v56 = vpop.f32.mrf.mxu1 }
  0xec   :  { %320 = vst [vmem:[%s628_s3 + $0x18] sm:$0xff] %v304_v51  ;;  %328 = vst [vmem:[%s628_s3 + $0x58] sm:$0xff] %v312_v52  ;;  %v303_v57 = vmax.f32 %v287_v53, 0.0  ;;  %v311_v58 = vmax.f32 %v295_v54, 0.0  ;;  %v290_v59 = vadd.f32 %v410_v55, %v337_v32  ;;  %v298_v60 = vadd.f32 %v422_v56, %v337_v32 }
  0xed   :  { %v168_v61 = vpop.f32.mrf.mxu0  ;;  %v208_v62 = vpop.f32.mrf.mxu1 }
  0xee   :  { %319 = vst [vmem:[%s628_s3 + $0x10] sm:$0xff] %v303_v57  ;;  %327 = vst [vmem:[%s628_s3 + $0x50] sm:$0xff] %v311_v58  ;;  %v306_v63 = vmax.f32 %v290_v59, 0.0  ;;  %v314_v0 = vmax.f32 %v298_v60, 0.0  ;;  %v289_v1 = vadd.f32 %v337_v32, %v168_v61  ;;  %v297_v2 = vadd.f32 %v337_v32, %v208_v62 }
  0xef   :  { %v413_v3 = vpop.f32.mrf.mxu0  ;;  %v425_v4 = vpop.f32.mrf.mxu1 }
  0xf0   :  { %322 = vst [vmem:[%s628_s3 + $0x28] sm:$0xff] %v306_v63  ;;  %330 = vst [vmem:[%s628_s3 + $0x68] sm:$0xff] %v314_v0  ;;  %v305_v5 = vmax.f32 %v289_v1, 0.0  ;;  %v313_v6 = vmax.f32 %v297_v2, 0.0  ;;  %v292_v7 = vadd.f32 %v413_v3, %v337_v32  ;;  %v300_v8 = vadd.f32 %v425_v4, %v337_v32 }
  0xf1   :  { %v178_v9 = vpop.f32.mrf.mxu0  ;;  %v218_v10 = vpop.f32.mrf.mxu1 }
  0xf2   :  { %321 = vst [vmem:[%s628_s3 + $0x20] sm:$0xff] %v305_v5  ;;  %329 = vst [vmem:[%s628_s3 + $0x60] sm:$0xff] %v313_v6  ;;  %v308_v11 = vmax.f32 %v292_v7, 0.0  ;;  %v316_v12 = vmax.f32 %v300_v8, 0.0  ;;  %v291_v13 = vadd.f32 %v337_v32, %v178_v9  ;;  %v299_v14 = vadd.f32 %v337_v32, %v218_v10 }
  0xf4   :  { %324 = vst [vmem:[%s628_s3 + $0x38] sm:$0xff] %v308_v11  ;;  %332 = vst [vmem:[%s628_s3 + $0x78] sm:$0xff] %v316_v12  ;;  %v307_v15 = vmax.f32 %v291_v13, 0.0  ;;  %v315_v16 = vmax.f32 %v299_v14, 0.0 }
  0xf6   :  { %323 = vst [vmem:[%s628_s3 + $0x30] sm:$0xff] %v307_v15  ;;  %331 = vst [vmem:[%s628_s3 + $0x70] sm:$0xff] %v315_v16 }

// kernel: gcorn_forward.11
= control target key start
LH: loop header
LB: loop body
LE: loop exit
PB: predicated region body
PF: predicated region fallthrough
CT: control target
= control target key end

     0   :  { %s913_s1 = inlined_call_operand.vmem [shape: f32[128,128], index: 1, kind: input, shape index: {}]   ;;  %s914_s0 = inlined_call_operand.vmem [shape: f32[128,128], index: 0, kind: input, shape index: {}]   ;;  %s915_s2 = inlined_call_operand.vmem [shape: f32[1,128], index: 2, kind: input, shape index: {}]   ;;  %s916_s3 = inlined_call_operand.vmem [shape: f32[128,128], index: 3, kind: output, shape index: {}]  }
   0x1   :  { %v81_v0 = vld [vmem:[%s913_s1 + $0x78] sm:$0xff]  ;;  %v80_v1 = vld [vmem:[%s913_s1 + $0x70] sm:$0xff]  ;;  %v79_v2 = vld [vmem:[%s913_s1 + $0x68] sm:$0xff] }
   0x2   :  { %514 = vmatprep.subr.mxu0 %v81_v0  ;;  %570 = vmatprep.subr.mxu1 %v81_v0  ;;  %v78_v3 = vld [vmem:[%s913_s1 + $0x60] sm:$0xff]  ;;  %v77_v4 = vld [vmem:[%s913_s1 + $0x58] sm:$0xff]  ;;  %v76_v5 = vld [vmem:[%s913_s1 + $0x50] sm:$0xff] }
   0x3   :  { %515 = vmatpush3.msra.mxu0 %v81_v0  ;;  %586 = vmatpush3.msra.mxu1 %v81_v0  ;;  %v75_v6 = vld [vmem:[%s913_s1 + $0x48] sm:$0xff]  ;;  %v74_v7 = vld [vmem:[%s913_s1 + $0x40] sm:$0xff]  ;;  %v73_v8 = vld [vmem:[%s913_s1 + $0x38] sm:$0xff] }
   0x4   :  { %516 = vmatprep.subr.mxu0 %v80_v1  ;;  %571 = vmatprep.subr.mxu1 %v80_v1  ;;  %v72_v9 = vld [vmem:[%s913_s1 + $0x30] sm:$0xff]  ;;  %v71_v10 = vld [vmem:[%s913_s1 + $0x28] sm:$0xff]  ;;  %v70_v11 = vld [vmem:[%s913_s1 + $0x20] sm:$0xff] }
   0x5   :  { %517 = vmatpush3.msra.mxu0 %v80_v1  ;;  %587 = vmatpush3.msra.mxu1 %v80_v1  ;;  %v69_v12 = vld [vmem:[%s913_s1 + $0x18] sm:$0xff]  ;;  %v68_v13 = vld [vmem:[%s913_s1 + $0x10] sm:$0xff]  ;;  %v67_v14 = vld [vmem:[%s913_s1 + $0x8] sm:$0xff] }
   0x6   :  { %518 = vmatprep.subr.mxu0 %v79_v2  ;;  %572 = vmatprep.subr.mxu1 %v79_v2  ;;  %v66_v15 = vld [vmem:[%s913_s1] sm:$0xff]  ;;  %v51_v18 = vld [vmem:[%s914_s0 + $0x8] sm:$0xff]  ;;  %v52_v20 = vld [vmem:[%s914_s0 + $0x10] sm:$0xff] }
   0x7   :  { %519 = vmatpush3.msra.mxu0 %v79_v2  ;;  %588 = vmatpush3.msra.mxu1 %v79_v2  ;;  %v50_v16 = vld [vmem:[%s914_s0] sm:$0xff]  ;;  %v59_v19 = vld [vmem:[%s914_s0 + $0x48] sm:$0xff]  ;;  %v60_v21 = vld [vmem:[%s914_s0 + $0x50] sm:$0xff] }
   0x8   :  { %520 = vmatprep.subr.mxu0 %v78_v3  ;;  %573 = vmatprep.subr.mxu1 %v78_v3  ;;  %v58_v17 = vld [vmem:[%s914_s0 + $0x40] sm:$0xff]  ;;  %v53_v22 = vld [vmem:[%s914_s0 + $0x18] sm:$0xff]  ;;  %v55_v26 = vld [vmem:[%s914_s0 + $0x28] sm:$0xff] }
   0x9   :  { %521 = vmatpush3.msra.mxu0 %v78_v3  ;;  %589 = vmatpush3.msra.mxu1 %v78_v3  ;;  %v61_v23 = vld [vmem:[%s914_s0 + $0x58] sm:$0xff]  ;;  %v54_v24 = vld [vmem:[%s914_s0 + $0x20] sm:$0xff]  ;;  %v63_v27 = vld [vmem:[%s914_s0 + $0x68] sm:$0xff] }
   0xa   :  { %522 = vmatprep.subr.mxu0 %v77_v4  ;;  %574 = vmatprep.subr.mxu1 %v77_v4  ;;  %v62_v25 = vld [vmem:[%s914_s0 + $0x60] sm:$0xff]  ;;  %v56_v28 = vld [vmem:[%s914_s0 + $0x30] sm:$0xff]  ;;  %v57_v30 = vld [vmem:[%s914_s0 + $0x38] sm:$0xff] }
   0xb   :  { %523 = vmatpush3.msra.mxu0 %v77_v4  ;;  %590 = vmatpush3.msra.mxu1 %v77_v4  ;;  %v64_v29 = vld [vmem:[%s914_s0 + $0x70] sm:$0xff]  ;;  %v65_v31 = vld [vmem:[%s914_s0 + $0x78] sm:$0xff]  ;;  %v481_v32 = vld [vmem:[%s915_s2] ss:$0 sm:$0xff] }
   0xc   :  { %524 = vmatprep.subr.mxu0 %v76_v5  ;;  %575 = vmatprep.subr.mxu1 %v76_v5 }
   0xd   :  { %525 = vmatpush3.msra.mxu0 %v76_v5  ;;  %591 = vmatpush3.msra.mxu1 %v76_v5 }
   0xe   :  { %526 = vmatprep.subr.mxu0 %v75_v6  ;;  %576 = vmatprep.subr.mxu1 %v75_v6 }
   0xf   :  { %527 = vmatpush3.msra.mxu0 %v75_v6  ;;  %592 = vmatpush3.msra.mxu1 %v75_v6 }
  0x10   :  { %528 = vmatprep.subr.mxu0 %v74_v7  ;;  %577 = vmatprep.subr.mxu1 %v74_v7 }
  0x11   :  { %529 = vmatpush3.msra.mxu0 %v74_v7  ;;  %593 = vmatpush3.msra.mxu1 %v74_v7 }
  0x12   :  { %530 = vmatprep.subr.mxu0 %v73_v8  ;;  %578 = vmatprep.subr.mxu1 %v73_v8 }
  0x13   :  { %531 = vmatpush3.msra.mxu0 %v73_v8  ;;  %594 = vmatpush3.msra.mxu1 %v73_v8 }
  0x14   :  { %532 = vmatprep.subr.mxu0 %v72_v9  ;;  %579 = vmatprep.subr.mxu1 %v72_v9 }
  0x15   :  { %533 = vmatpush3.msra.mxu0 %v72_v9  ;;  %595 = vmatpush3.msra.mxu1 %v72_v9 }
  0x16   :  { %534 = vmatprep.subr.mxu0 %v71_v10  ;;  %580 = vmatprep.subr.mxu1 %v71_v10 }
  0x17   :  { %535 = vmatpush3.msra.mxu0 %v71_v10  ;;  %596 = vmatpush3.msra.mxu1 %v71_v10 }
  0x18   :  { %536 = vmatprep.subr.mxu0 %v70_v11  ;;  %581 = vmatprep.subr.mxu1 %v70_v11 }
  0x19   :  { %537 = vmatpush3.msra.mxu0 %v70_v11  ;;  %597 = vmatpush3.msra.mxu1 %v70_v11 }
  0x1a   :  { %538 = vmatprep.subr.mxu0 %v69_v12  ;;  %582 = vmatprep.subr.mxu1 %v69_v12 }
  0x1b   :  { %539 = vmatpush3.msra.mxu0 %v69_v12  ;;  %598 = vmatpush3.msra.mxu1 %v69_v12 }
  0x1c   :  { %540 = vmatprep.subr.mxu0 %v68_v13  ;;  %583 = vmatprep.subr.mxu1 %v68_v13 }
  0x1d   :  { %541 = vmatpush3.msra.mxu0 %v68_v13  ;;  %599 = vmatpush3.msra.mxu1 %v68_v13 }
  0x1e   :  { %542 = vmatprep.subr.mxu0 %v67_v14  ;;  %584 = vmatprep.subr.mxu1 %v67_v14 }
  0x1f   :  { %543 = vmatpush3.msra.mxu0 %v67_v14  ;;  %600 = vmatpush3.msra.mxu1 %v67_v14 }
  0x20   :  { %544 = vmatprep.subr.mxu0 %v66_v15  ;;  %585 = vmatprep.subr.mxu1 %v66_v15 }
  0x21   :  { %545 = vmatpush3.msra.mxu0 %v66_v15  ;;  %601 = vmatpush3.msra.mxu1 %v66_v15 }
  0x22   :  { %546 = vmatprep.mubr.f32.mxu0 %v50_v16  ;;  %558 = vmatprep.mubr.f32.mxu1 %v58_v17 }
  0x23   :  { %547 = vmatmul.mubr.f32.vlgmr.msra.gmra.mxu0 %v51_v18  ;;  %559 = vmatmul.mubr.f32.vlgmr.msra.gmra.mxu1 %v59_v19 }
  0x24   :  { %549 = vmatprep.mubr.f32.mxu0 %v52_v20  ;;  %561 = vmatprep.mubr.f32.mxu1 %v60_v21 }
  0x27   :  { %550 = vmatmul.mubr.f32.gmra.mxu0 %v53_v22  ;;  %562 = vmatmul.mubr.f32.gmra.mxu1 %v61_v23 }
  0x28   :  { %552 = vmatprep.mubr.f32.mxu0 %v54_v24  ;;  %564 = vmatprep.mubr.f32.mxu1 %v62_v25 }
  0x2b   :  { %553 = vmatmul.mubr.f32.gmra.mxu0 %v55_v26  ;;  %565 = vmatmul.mubr.f32.gmra.mxu1 %v63_v27 }
  0x2c   :  { %555 = vmatprep.mubr.f32.mxu0 %v56_v28  ;;  %567 = vmatprep.mubr.f32.mxu1 %v64_v29 }
  0x2f   :  { %556 = vmatmul.mubr.f32.gmra.mxu0 %v57_v30  ;;  %568 = vmatmul.mubr.f32.gmra.mxu1 %v65_v31 }
  0xe3   :  { %v548_v33 = vpop.f32.mrf.mxu0  ;;  %v560_v34 = vpop.f32.mrf.mxu1 }
  0xe4   :  { %v286_v35 = vadd.f32 %v548_v33, %v481_v32  ;;  %v294_v36 = vadd.f32 %v560_v34, %v481_v32 }
  0xe5   :  { %v148_v37 = vpop.f32.mrf.mxu0  ;;  %v188_v38 = vpop.f32.mrf.mxu1 }
  0xe6   :  { %319 = vmax.xlane.f32.xlu1 %v294_v36  ;;  %303 = vmax.xlane.f32.xlu0 %v286_v35  ;;  %v285_v40 = vadd.f32 %v481_v32, %v148_v37  ;;  %v293_v46 = vadd.f32 %v481_v32, %v188_v38 }
  0xe7   :  { %v551_v39 = vpop.f32.mrf.mxu0  ;;  %v563_v43 = vpop.f32.mrf.mxu1 }
  0xe8   :  { %v288_v41 = vadd.f32 %v551_v39, %v481_v32  ;;  %v296_v44 = vadd.f32 %v563_v43, %v481_v32 }
  0xe9   :  { %v158_v42 = vpop.f32.mrf.mxu0  ;;  %v198_v47 = vpop.f32.mrf.mxu1 }
  0xea   :  { %301 = vmax.xlane.f32.xlu0 %v285_v40  ;;  %307 = vmax.xlane.f32.xlu1 %v288_v41  ;;  %v287_v50 = vadd.f32 %v481_v32, %v158_v42  ;;  %v295_v51 = vadd.f32 %v481_v32, %v198_v47 }
  0xeb   :  { %v554_v45 = vpop.f32.mrf.mxu0  ;;  %v566_v49 = vpop.f32.mrf.mxu1 }
  0xec   :  { %v290_v52 = vadd.f32 %v554_v45, %v481_v32  ;;  %v298_v56 = vadd.f32 %v566_v49, %v481_v32 }
  0xed   :  { %v168_v48 = vpop.f32.mrf.mxu0  ;;  %v208_v54 = vpop.f32.mrf.mxu1 }
  0xee   :  { %317 = vmax.xlane.f32.xlu0 %v293_v46  ;;  %323 = vmax.xlane.f32.xlu1 %v296_v44  ;;  %v289_v53 = vadd.f32 %v481_v32, %v168_v48  ;;  %v297_v57 = vadd.f32 %v481_v32, %v208_v54 }
  0xef   :  { %v557_v55 = vpop.f32.mrf.mxu0  ;;  %v569_v59 = vpop.f32.mrf.mxu1 }
  0xf0   :  { %v785_v60 = vadd.f32 %v557_v55, %v481_v32  ;;  %v789_v63 = vadd.f32 %v569_v59, %v481_v32 }
  0xf1   :  { %v178_v58 = vpop.f32.mrf.mxu0  ;;  %v218_v62 = vpop.f32.mrf.mxu1 }
  0xf2   :  { %321 = vmax.xlane.f32.xlu0 %v295_v51  ;;  %305 = vmax.xlane.f32.xlu1 %v287_v50  ;;  %v787_v61 = vadd.f32 %v481_v32, %v178_v58  ;;  %v793_v0 = vadd.f32 %v481_v32, %v218_v62 }
  0xf6   :  { %311 = vmax.xlane.f32.xlu1 %v290_v52  ;;  %309 = vmax.xlane.f32.xlu0 %v289_v53 }
  0xfa   :  { %327 = vmax.xlane.f32.xlu1 %v298_v56  ;;  %325 = vmax.xlane.f32.xlu0 %v297_v57 }
  0xfe   :  { %315 = vmax.xlane.f32.xlu1 %v785_v60  ;;  %313 = vmax.xlane.f32.xlu0 %v787_v61 }
 0x102   :  { %331 = vmax.xlane.f32.xlu1 %v789_v63  ;;  %329 = vmax.xlane.f32.xlu0 %v793_v0 }
 0x16f   :  { %v320_v1 = vpop.xlane.xlu1 %319  ;;  %v304_v2 = vpop.xlane.xlu0 %303 }
 0x170   :  { %v797_v3 = vsub.f32 %v286_v35, %v304_v2  ;;  %v799_v4 = vsub.f32 %v294_v36, %v320_v1 }
 0x172   :  { %v351_v5 = vmul.f32 1.442695, %v797_v3  ;;  %v367_v9 = vmul.f32 1.442695, %v799_v4 }
 0x173   :  { %v302_v6 = vpop.xlane.xlu0 %301  ;;  %v308_v7 = vpop.xlane.xlu1 %307 }
 0x174   :  { %v802_v8 = vsub.f32 %v285_v40, %v302_v6  ;;  %602 = vpow2.f32 %v351_v5  ;;  %v805_v10 = vsub.f32 %v288_v41, %v308_v7 }
 0x176   :  { %v349_v11 = vmul.f32 1.442695, %v802_v8  ;;  %v355_v16 = vmul.f32 1.442695, %v805_v10 }
 0x177   :  { %v318_v12 = vpop.xlane.xlu0 %317  ;;  %v324_v13 = vpop.xlane.xlu1 %323 }
 0x178   :  { %604 = vpow2.f32 %v349_v11  ;;  %v808_v14 = vsub.f32 %v293_v46, %v318_v12  ;;  %v810_v15 = vsub.f32 %v296_v44, %v324_v13 }
 0x179   :  { %606 = vpow2.f32 %v367_v9 }
 0x17a   :  { %v365_v17 = vmul.f32 1.442695, %v808_v14  ;;  %v371_v20 = vmul.f32 1.442695, %v810_v15 }
 0x17b   :  { %v322_v18 = vpop.xlane.xlu0 %321  ;;  %v306_v19 = vpop.xlane.xlu1 %305 }
 0x17c   :  { %608 = vpow2.f32 %v365_v17  ;;  %v815_v21 = vsub.f32 %v287_v50, %v306_v19  ;;  %v817_v22 = vsub.f32 %v295_v51, %v322_v18 }
 0x17d   :  { %610 = vpow2.f32 %v355_v16 }
 0x17e   :  { %v353_v23 = vmul.f32 1.442695, %v815_v21  ;;  %612 = vpow2.f32 %v371_v20  ;;  %v369_v27 = vmul.f32 1.442695, %v817_v22 }
 0x17f   :  { %v312_v24 = vpop.xlane.xlu1 %311  ;;  %v310_v25 = vpop.xlane.xlu0 %309 }
 0x180   :  { %v820_v26 = vsub.f32 %v290_v52, %v312_v24  ;;  %614 = vpow2.f32 %v353_v23  ;;  %v823_v28 = vsub.f32 %v289_v53, %v310_v25 }
 0x181   :  { %v603_v29 = vpop.eup %602 }
 0x182   :  { %v359_v30 = vmul.f32 1.442695, %v820_v26  ;;  %383 = vadd.xlane.f32.xlu1 %v603_v29  ;;  %v357_v35 = vmul.f32 1.442695, %v823_v28 }
 0x183   :  { %v328_v31 = vpop.xlane.xlu1 %327  ;;  %v326_v32 = vpop.xlane.xlu0 %325 }
 0x184   :  { %616 = vpow2.f32 %v359_v30  ;;  %v826_v33 = vsub.f32 %v298_v56, %v328_v31  ;;  %v829_v36 = vsub.f32 %v297_v57, %v326_v32 }
 0x185   :  { %v605_v34 = vpop.eup %604  ;;  %618 = vpow2.f32 %v369_v27 }
 0x186   :  { %v607_v37 = vpop.eup %606  ;;  %v375_v38 = vmul.f32 1.442695, %v826_v33  ;;  %381 = vadd.xlane.f32.xlu0 %v605_v34  ;;  %v373_v43 = vmul.f32 1.442695, %v829_v36 }
 0x187   :  { %399 = vadd.xlane.f32.xlu1 %v607_v37  ;;  %v316_v39 = vpop.xlane.xlu1 %315  ;;  %v314_v40 = vpop.xlane.xlu0 %313 }
 0x188   :  { %620 = vpow2.f32 %v375_v38  ;;  %v833_v41 = vsub.f32 %v785_v60, %v316_v39  ;;  %v837_v44 = vsub.f32 %v787_v61, %v314_v40 }
 0x189   :  { %v609_v42 = vpop.eup %608  ;;  %622 = vpow2.f32 %v357_v35 }
 0x18a   :  { %v611_v45 = vpop.eup %610  ;;  %v363_v46 = vmul.f32 1.442695, %v833_v41  ;;  %397 = vadd.xlane.f32.xlu0 %v609_v42  ;;  %v361_v51 = vmul.f32 1.442695, %v837_v44 }
 0x18b   :  { %387 = vadd.xlane.f32.xlu1 %v611_v45  ;;  %v332_v47 = vpop.xlane.xlu1 %331  ;;  %v330_v48 = vpop.xlane.xlu0 %329 }
 0x18c   :  { %624 = vpow2.f32 %v363_v46  ;;  %v841_v49 = vsub.f32 %v789_v63, %v332_v47  ;;  %v613_v50 = vpop.eup %612  ;;  %v845_v52 = vsub.f32 %v793_v0, %v330_v48 }
 0x18d   :  { %626 = vpow2.f32 %v373_v43  ;;  %v615_v53 = vpop.eup %614 }
 0x18e   :  { %v379_v54 = vmul.f32 1.442695, %v841_v49  ;;  %385 = vadd.xlane.f32.xlu0 %v615_v53  ;;  %v377_v56 = vmul.f32 1.442695, %v845_v52 }
 0x18f   :  { %403 = vadd.xlane.f32.xlu1 %v613_v50 }
 0x190   :  { %628 = vpow2.f32 %v379_v54 }
 0x191   :  { %v617_v55 = vpop.eup %616  ;;  %630 = vpow2.f32 %v361_v51 }
 0x192   :  { %v619_v57 = vpop.eup %618  ;;  %632 = vpow2.f32 %v377_v56 }
 0x193   :  { %391 = vadd.xlane.f32.xlu1 %v617_v55  ;;  %401 = vadd.xlane.f32.xlu0 %v619_v57 }
 0x195   :  { %v621_v58 = vpop.eup %620 }
 0x196   :  { %v623_v59 = vpop.eup %622 }
 0x197   :  { %407 = vadd.xlane.f32.xlu1 %v621_v58  ;;  %389 = vadd.xlane.f32.xlu0 %v623_v59 }
 0x199   :  { %v625_v60 = vpop.eup %624 }
 0x19a   :  { %v627_v61 = vpop.eup %626 }
 0x19b   :  { %395 = vadd.xlane.f32.xlu1 %v625_v60  ;;  %405 = vadd.xlane.f32.xlu0 %v627_v61 }
 0x19d   :  { %v629_v62 = vpop.eup %628 }
 0x19e   :  { %v631_v63 = vpop.eup %630 }
 0x19f   :  { %411 = vadd.xlane.f32.xlu1 %v629_v62  ;;  %393 = vadd.xlane.f32.xlu0 %v631_v63  ;;  %v633_v0 = vpop.eup %632 }
 0x1a3   :  { %409 = vadd.xlane.f32.xlu0 %v633_v0 }
 0x20b   :  { %v384_v1 = vpop.xlane.xlu1 %383 }
 0x20c   :  { %634 = vlog2.f32 %v384_v1 }
 0x20f   :  { %v382_v2 = vpop.xlane.xlu0 %381 }
 0x210   :  { %v400_v5 = vpop.xlane.xlu1 %399  ;;  %636 = vlog2.f32 %v382_v2 }
 0x211   :  { %638 = vlog2.f32 %v400_v5 }
 0x213   :  { %v398_v6 = vpop.xlane.xlu0 %397 }
 0x214   :  { %v388_v7 = vpop.xlane.xlu1 %387  ;;  %640 = vlog2.f32 %v398_v6 }
 0x215   :  { %642 = vlog2.f32 %v388_v7 }
 0x217   :  { %v386_v11 = vpop.xlane.xlu0 %385 }
 0x218   :  { %v404_v9 = vpop.xlane.xlu1 %403 }
 0x219   :  { %644 = vlog2.f32 %v404_v9  ;;  %v635_v12 = vpop.eup %634 }
 0x21a   :  { %646 = vlog2.f32 %v386_v11  ;;  %v416_v13 = vmul.f32 0.6931472, %v635_v12 }
 0x21c   :  { %v392_v16 = vpop.xlane.xlu1 %391  ;;  %v402_v17 = vpop.xlane.xlu0 %401  ;;  %v446_v19 = vsub.f32 %v797_v3, %v416_v13 }
 0x21d   :  { %v637_v18 = vpop.eup %636  ;;  %648 = vlog2.f32 %v392_v16 }
 0x21e   :  { %v639_v20 = vpop.eup %638  ;;  %v414_v23 = vmul.f32 0.6931472, %v637_v18  ;;  %650 = vlog2.f32 %v402_v17  ;;  %462 = vst [vmem:[%s916_s3 + $0x8] sm:$0xff] %v446_v19 }
 0x21f   :  { %v432_v24 = vmul.f32 0.6931472, %v639_v20 }
 0x220   :  { %v445_v25 = vsub.f32 %v802_v8, %v414_v23  ;;  %v408_v27 = vpop.xlane.xlu1 %407  ;;  %v390_v29 = vpop.xlane.xlu0 %389 }
 0x221   :  { %v641_v30 = vpop.eup %640  ;;  %v454_v31 = vsub.f32 %v799_v4, %v432_v24  ;;  %652 = vlog2.f32 %v408_v27 }
 0x222   :  { %v643_v32 = vpop.eup %642  ;;  %461 = vst [vmem:[%s916_s3] sm:$0xff] %v445_v25  ;;  %v430_v3 = vmul.f32 0.6931472, %v641_v30  ;;  %654 = vlog2.f32 %v390_v29 }
 0x223   :  { %470 = vst [vmem:[%s916_s3 + $0x48] sm:$0xff] %v454_v31  ;;  %v420_v34 = vmul.f32 0.6931472, %v643_v32 }
 0x224   :  { %v453_v8 = vsub.f32 %v808_v14, %v430_v3  ;;  %v396_v35 = vpop.xlane.xlu1 %395  ;;  %v406_v37 = vpop.xlane.xlu0 %405 }
 0x225   :  { %v448_v38 = vsub.f32 %v805_v10, %v420_v34  ;;  %656 = vlog2.f32 %v396_v35 }
 0x226   :  { %v645_v4 = vpop.eup %644  ;;  %469 = vst [vmem:[%s916_s3 + $0x40] sm:$0xff] %v453_v8  ;;  %658 = vlog2.f32 %v406_v37 }
 0x227   :  { %v647_v39 = vpop.eup %646  ;;  %464 = vst [vmem:[%s916_s3 + $0x18] sm:$0xff] %v448_v38  ;;  %v436_v40 = vmul.f32 0.6931472, %v645_v4 }
 0x228   :  { %v418_v42 = vmul.f32 0.6931472, %v647_v39  ;;  %v412_v43 = vpop.xlane.xlu1 %411  ;;  %v394_v14 = vpop.xlane.xlu0 %393 }
 0x229   :  { %v456_v45 = vsub.f32 %v810_v15, %v436_v40  ;;  %660 = vlog2.f32 %v412_v43 }
 0x22a   :  { %v649_v10 = vpop.eup %648  ;;  %v447_v46 = vsub.f32 %v815_v21, %v418_v42  ;;  %662 = vlog2.f32 %v394_v14 }
 0x22b   :  { %v651_v47 = vpop.eup %650  ;;  %472 = vst [vmem:[%s916_s3 + $0x58] sm:$0xff] %v456_v45  ;;  %v424_v48 = vmul.f32 0.6931472, %v649_v10 }
 0x22c   :  { %463 = vst [vmem:[%s916_s3 + $0x10] sm:$0xff] %v447_v46  ;;  %v434_v50 = vmul.f32 0.6931472, %v651_v47  ;;  %v410_v51 = vpop.xlane.xlu0 %409 }
 0x22d   :  { %v450_v53 = vsub.f32 %v820_v26, %v424_v48  ;;  %664 = vlog2.f32 %v410_v51 }
 0x22e   :  { %v653_v15 = vpop.eup %652  ;;  %v455_v54 = vsub.f32 %v817_v22, %v434_v50 }
 0x22f   :  { %v655_v21 = vpop.eup %654  ;;  %466 = vst [vmem:[%s916_s3 + $0x28] sm:$0xff] %v450_v53  ;;  %v440_v55 = vmul.f32 0.6931472, %v653_v15 }
 0x230   :  { %471 = vst [vmem:[%s916_s3 + $0x50] sm:$0xff] %v455_v54  ;;  %v422_v56 = vmul.f32 0.6931472, %v655_v21 }
 0x231   :  { %v458_v57 = vsub.f32 %v826_v33, %v440_v55 }
 0x232   :  { %v657_v58 = vpop.eup %656  ;;  %v449_v26 = vsub.f32 %v823_v28, %v422_v56 }
 0x233   :  { %v659_v59 = vpop.eup %658  ;;  %474 = vst [vmem:[%s916_s3 + $0x68] sm:$0xff] %v458_v57  ;;  %v428_v22 = vmul.f32 0.6931472, %v657_v58 }
 0x234   :  { %465 = vst [vmem:[%s916_s3 + $0x20] sm:$0xff] %v449_v26  ;;  %v438_v60 = vmul.f32 0.6931472, %v659_v59 }
 0x235   :  { %v452_v61 = vsub.f32 %v833_v41, %v428_v22 }
 0x236   :  { %v661_v62 = vpop.eup %660  ;;  %v457_v63 = vsub.f32 %v829_v36, %v438_v60 }
 0x237   :  { %v663_v33 = vpop.eup %662  ;;  %468 = vst [vmem:[%s916_s3 + $0x38] sm:$0xff] %v452_v61  ;;  %v444_v28 = vmul.f32 0.6931472, %v661_v62 }
 0x238   :  { %473 = vst [vmem:[%s916_s3 + $0x60] sm:$0xff] %v457_v63  ;;  %v426_v0 = vmul.f32 0.6931472, %v663_v33 }
 0x239   :  { %v460_v1 = vsub.f32 %v841_v49, %v444_v28 }
 0x23a   :  { %v665_v2 = vpop.eup %664  ;;  %v451_v5 = vsub.f32 %v837_v44, %v426_v0 }
 0x23b   :  { %476 = vst [vmem:[%s916_s3 + $0x78] sm:$0xff] %v460_v1  ;;  %v442_v36 = vmul.f32 0.6931472, %v665_v2 }
 0x23c   :  { %467 = vst [vmem:[%s916_s3 + $0x30] sm:$0xff] %v451_v5 }
 0x23d   :  { %v459_v41 = vsub.f32 %v845_v52, %v442_v36 }
 0x23f   :  { %475 = vst [vmem:[%s916_s3 + $0x70] sm:$0xff] %v459_v41 }

</bundles_post_ra>
